<compile_context>
chip_gen: v7x
topology: tpu7x:2x2x1
jax: 0.10.0
libtpu: 0.0.40
codegen_flags: <defaults>
</compile_context>

<pallas_src>
import jax
import jax.numpy as jnp
from jax import lax
from jax.experimental import pallas as pl
from jax.experimental.pallas import tpu as pltpu

_LANES = 128   # lane width of the 2-D view; 128 => unmasked full-vreg stores


def _bbox_kernel(b_ref, d_ref, mean_ref, std_ref, out_ref):
    # b_ref / d_ref / out_ref: (bm, 128) dense f32 tiles.  Lanes are the
    # flattened [..., 4] coordinate axis: lane j holds coordinate j % 4
    # (x1, y1, x2, y2).  mean_ref / std_ref: (1, 128) lane-replicated rows
    # holding mean[j % 4] / std[j % 4].
    b = b_ref[...]
    d = d_ref[...]

    n_lanes = b.shape[-1]
    left2 = lambda v: pltpu.roll(v, n_lanes - 2, axis=1)   # out[j] = v[(j + 2) % n]
    right2 = lambda v: pltpu.roll(v, 2, axis=1)            # out[j] = v[(j - 2) % n]

    # Normalized deltas: dx, dy, dw, dh live at lanes j % 4 == 0, 1, 2, 3.
    nrm = d * std_ref[...] + mean_ref[...]

    # widths / heights at lanes j % 4 == 0 / 1 (x2 - x1, y2 - y1).
    sizes = left2(b) - b
    ctr = b + 0.5 * sizes                        # ctr_x / ctr_y at lanes 0 / 1 (mod 4)
    pred_ctr = ctr + nrm * sizes                 # pred_ctr_x / pred_ctr_y at lanes 0 / 1
    pred_size = left2(jnp.exp(nrm)) * sizes      # exp(dw)*w / exp(dh)*h at lanes 0 / 1

    lo = pred_ctr - 0.5 * pred_size              # x1_out / y1_out valid at lanes 0 / 1
    hi = pred_ctr + 0.5 * pred_size              # x2_out / y2_out values at lanes 0 / 1

    lane = lax.broadcasted_iota(jnp.int32, b.shape, 1)
    is_lo = (lane & 3) < 2                       # lanes 0,1 of each box take lo
    out_ref[...] = jnp.where(is_lo, lo, right2(hi))   # single unmasked full-tile store


def bbox_transform(boxes, deltas, mean=None, std=None, *, block_rows=2048):
    """RetinaNet box decoding.  boxes, deltas: [B, N, 4] -> [B, N, 4] float32."""
    if mean is None:
        mean = jnp.array([0.0, 0.0, 0.0, 0.0], jnp.float32)
    if std is None:
        std = jnp.array([0.1, 0.1, 0.2, 0.2], jnp.float32)
    mean = jnp.asarray(mean, jnp.float32).reshape(4)
    std = jnp.asarray(std, jnp.float32).reshape(4)

    B, N, C = boxes.shape
    assert C == 4

    total = B * N * 4

    # --- pick the tile height first, then pad so rows % bm == 0 exactly -------
    rows0 = pl.cdiv(total, _LANES)
    rows0 = pl.cdiv(rows0, 8) * 8                # sublane-aligned row count
    bm = min(block_rows, rows0)
    bm -= bm % 8
    bm = max(bm, 8)
    # Keep >= 4 grid steps when the problem is big enough (both v7x TCs busy).
    while pl.cdiv(rows0, bm) < 4 and bm > 8:
        bm = max(8, (bm // 2) - ((bm // 2) % 8))
    rows = pl.cdiv(rows0, bm) * bm               # exact multiple of bm -> full tiles only
    padded = rows * _LANES
    grid = (rows // bm,)

    b_flat = boxes.astype(jnp.float32).reshape(-1)   # free: contiguous reshape, no transpose
    d_flat = deltas.astype(jnp.float32).reshape(-1)
    if padded != total:
        # Tail-pad path (single cheap copy); guarantees unmasked full-tile stores.
        b_flat = jnp.pad(b_flat, (0, padded - total))
        d_flat = jnp.pad(d_flat, (0, padded - total))

    b2 = b_flat.reshape(rows, _LANES)
    d2 = d_flat.reshape(rows, _LANES)

    # Lane-replicated mean/std rows: value at lane j is mean[j % 4] / std[j % 4].
    mean_row = jnp.tile(mean, _LANES // 4).reshape(1, _LANES)
    std_row = jnp.tile(std, _LANES // 4).reshape(1, _LANES)

    tile = pl.BlockSpec((bm, _LANES), lambda i: (i, 0))
    const = pl.BlockSpec((1, _LANES), lambda i: (0, 0))

    out2 = pl.pallas_call(
        _bbox_kernel,
        out_shape=jax.ShapeDtypeStruct((rows, _LANES), jnp.float32),
        grid=grid,
        in_specs=[tile, tile, const, const],
        out_specs=tile,
        compiler_params=pltpu.CompilerParams(
            dimension_semantics=("parallel",)),
    )(b2, d2, mean_row, std_row)

    return out2.reshape(-1)[:total].reshape(B, N, 4)


def bbox_transform_ref(boxes, deltas, mean, std):
    """Pure-JAX reference mirroring the PyTorch forward."""
    widths = boxes[:, :, 2] - boxes[:, :, 0]
    heights = boxes[:, :, 3] - boxes[:, :, 1]
    ctr_x = boxes[:, :, 0] + 0.5 * widths
    ctr_y = boxes[:, :, 1] + 0.5 * heights
    dx = deltas[:, :, 0] * std[0] + mean[0]
    dy = deltas[:, :, 1] * std[1] + mean[1]
    dw = deltas[:, :, 2] * std[2] + mean[2]
    dh = deltas[:, :, 3] * std[3] + mean[3]
    pred_ctr_x = ctr_x + dx * widths
    pred_ctr_y = ctr_y + dy * heights
    pred_w = jnp.exp(dw) * widths
    pred_h = jnp.exp(dh) * heights
    return jnp.stack([pred_ctr_x - 0.5 * pred_w,
                      pred_ctr_y - 0.5 * pred_h,
                      pred_ctr_x + 0.5 * pred_w,
                      pred_ctr_y + 0.5 * pred_h], axis=2)


if __name__ == "__main__":
    # Module buffers from __init__ defaults.
    mean = jnp.array([0.0, 0.0, 0.0, 0.0], dtype=jnp.float32)
    std = jnp.array([0.1, 0.1, 0.2, 0.2], dtype=jnp.float32)

    B, N = 2, 256
    key = jax.random.PRNGKey(0)
    k1, k2, k3 = jax.random.split(key, 3)

    # Valid boxes (x2 > x1, y2 > y1) and small random deltas.
    xy = jax.random.uniform(k1, (B, N, 2), jnp.float32, 0.0, 100.0)
    wh = jax.random.uniform(k2, (B, N, 2), jnp.float32, 1.0, 50.0)
    boxes = jnp.concatenate([xy, xy + wh], axis=-1)            # [B, N, 4]
    deltas = jax.random.normal(k3, (B, N, 4), jnp.float32)     # [B, N, 4]

    pred = bbox_transform(boxes, deltas, mean, std)
    pred = jax.block_until_ready(pred)

    ref = bbox_transform_ref(boxes, deltas, mean, std)
    assert pred.shape == (B, N, 4)
    assert jnp.allclose(pred, ref, atol=1e-4, rtol=1e-4)

    print("KERNEL_OK")
</pallas_src>

<mosaic_0001>
module attributes {stable_mosaic.version = 11 : i64} {
  func.func @_bbox_kernel(%arg0: i32, %arg1: memref<8x128xf32, #tpu.memory_space<vmem>>, %arg2: memref<8x128xf32, #tpu.memory_space<vmem>>, %arg3: memref<1x128xf32, #tpu.memory_space<vmem>>, %arg4: memref<1x128xf32, #tpu.memory_space<vmem>>, %arg5: memref<8x128xf32, #tpu.memory_space<vmem>>) attributes {dimension_semantics = [#tpu.dimension_semantics<parallel>], iteration_bounds = array<i64: 2>, scalar_prefetch = 0 : i64, scratch_operands = 0 : i64, tpu.core_type = #tpu.core_type<tc>, window_params = [{transform_indices = @transform_0, window_bounds = array<i64: 8, 128>}, {transform_indices = @transform_1, window_bounds = array<i64: 8, 128>}, {pipeline_mode = #tpu.pipeline_mode<synchronous>, transform_indices = @transform_2, window_bounds = array<i64: 1, 128>}, {pipeline_mode = #tpu.pipeline_mode<synchronous>, transform_indices = @transform_3, window_bounds = array<i64: 1, 128>}, {transform_indices = @transform_4, window_bounds = array<i64: 8, 128>}]} {
    %c0 = arith.constant 0 : index
    %c0_0 = arith.constant 0 : index
    %0 = vector.load %arg1[%c0, %c0_0] : memref<8x128xf32, #tpu.memory_space<vmem>>, vector<8x128xf32>
    %c0_1 = arith.constant 0 : index
    %c0_2 = arith.constant 0 : index
    %1 = vector.load %arg2[%c0_1, %c0_2] : memref<8x128xf32, #tpu.memory_space<vmem>>, vector<8x128xf32>
    %c0_3 = arith.constant 0 : index
    %c0_4 = arith.constant 0 : index
    %2 = vector.load %arg4[%c0_3, %c0_4] : memref<1x128xf32, #tpu.memory_space<vmem>>, vector<1x128xf32>
    %3 = vector.broadcast %2 : vector<1x128xf32> to vector<8x128xf32>
    %4 = arith.mulf %1, %3 : vector<8x128xf32>
    %c0_5 = arith.constant 0 : index
    %c0_6 = arith.constant 0 : index
    %5 = vector.load %arg3[%c0_5, %c0_6] : memref<1x128xf32, #tpu.memory_space<vmem>>, vector<1x128xf32>
    %6 = vector.broadcast %5 : vector<1x128xf32> to vector<8x128xf32>
    %7 = arith.addf %4, %6 : vector<8x128xf32>
    %c126_i32 = arith.constant 126 : i32
    %8 = tpu.dynamic_rotate %0 by %c126_i32 dim 1 : vector<8x128xf32>, i32 -> vector<8x128xf32>
    %9 = arith.subf %8, %0 : vector<8x128xf32>
    %cst = arith.constant 5.000000e-01 : f32
    %10 = vector.broadcast %cst : f32 to vector<8x128xf32>
    %11 = arith.mulf %10, %9 : vector<8x128xf32>
    %12 = arith.addf %0, %11 : vector<8x128xf32>
    %13 = arith.mulf %7, %9 : vector<8x128xf32>
    %14 = arith.addf %12, %13 : vector<8x128xf32>
    %15 = math.exp %7 : vector<8x128xf32>
    %c126_i32_7 = arith.constant 126 : i32
    %16 = tpu.dynamic_rotate %15 by %c126_i32_7 dim 1 : vector<8x128xf32>, i32 -> vector<8x128xf32>
    %17 = arith.mulf %16, %9 : vector<8x128xf32>
    %cst_8 = arith.constant 5.000000e-01 : f32
    %18 = vector.broadcast %cst_8 : f32 to vector<8x128xf32>
    %19 = arith.mulf %18, %17 : vector<8x128xf32>
    %20 = arith.subf %14, %19 : vector<8x128xf32>
    %cst_9 = arith.constant 5.000000e-01 : f32
    %21 = vector.broadcast %cst_9 : f32 to vector<8x128xf32>
    %22 = arith.mulf %21, %17 : vector<8x128xf32>
    %23 = arith.addf %14, %22 : vector<8x128xf32>
    %24 = tpu.iota {dimensions = array<i32: 1>} : vector<8x128xi32>
    %c3_i32 = arith.constant 3 : i32
    %25 = vector.broadcast %c3_i32 : i32 to vector<8x128xi32>
    %26 = arith.andi %24, %25 : vector<8x128xi32>
    %c2_i32 = arith.constant 2 : i32
    %27 = vector.broadcast %c2_i32 : i32 to vector<8x128xi32>
    %28 = arith.cmpi slt, %26, %27 : vector<8x128xi32>
    %c2_i32_10 = arith.constant 2 : i32
    %29 = tpu.dynamic_rotate %23 by %c2_i32_10 dim 1 : vector<8x128xf32>, i32 -> vector<8x128xf32>
    %30 = arith.select %28, %20, %29 : vector<8x128xi1>, vector<8x128xf32>
    %c0_11 = arith.constant 0 : index
    %c0_12 = arith.constant 0 : index
    %31 = vector.load %arg5[%c0_11, %c0_12] : memref<8x128xf32, #tpu.memory_space<vmem>>, vector<8x128xf32>
    tpu.vector_store %arg5[%c0_11, %c0_12], %30 {strides = array<i32>} : memref<8x128xf32, #tpu.memory_space<vmem>>, vector<8x128xf32>,
    return
  }
  func.func @transform_0(%arg0: i32) -> (i32, i32) {
    %c0_i32 = arith.constant 0 : i32
    %c0_i32_0 = arith.constant 0 : i32
    return %arg0, %c0_i32 : i32, i32
  }
  func.func @transform_1(%arg0: i32) -> (i32, i32) {
    %c0_i32 = arith.constant 0 : i32
    %c0_i32_0 = arith.constant 0 : i32
    return %arg0, %c0_i32 : i32, i32
  }
  func.func @transform_2(%arg0: i32) -> (i32, i32) {
    %c0_i32 = arith.constant 0 : i32
    %c0_i32_0 = arith.constant 0 : i32
    %c0_i32_1 = arith.constant 0 : i32
    return %c0_i32, %c0_i32_0 : i32, i32
  }
  func.func @transform_3(%arg0: i32) -> (i32, i32) {
    %c0_i32 = arith.constant 0 : i32
    %c0_i32_0 = arith.constant 0 : i32
    %c0_i32_1 = arith.constant 0 : i32
    return %c0_i32, %c0_i32_0 : i32, i32
  }
  func.func @transform_4(%arg0: i32) -> (i32, i32) {
    %c0_i32 = arith.constant 0 : i32
    %c0_i32_0 = arith.constant 0 : i32
    return %arg0, %c0_i32 : i32, i32
  }
}

</mosaic_0001>

<bundles_post_ra>
// kernel: tpu_custom_call.1
= control target key start
LH: loop header
LB: loop body
LE: loop exit
PB: predicated region body
PF: predicated region fallthrough
CT: control target
= control target key end

     0   :  { %9 = vsyncpa [#allocation3], 0  ;;  %s852_s0 = inlined_call_operand.hbm [shape: f32[16,128], index: 0, kind: input, shape index: {}]   ;;  %s853_s1 = inlined_call_operand.hbm [shape: f32[16,128], index: 1, kind: input, shape index: {}]   ;;  %s854_s2 = inlined_call_operand.vmem [shape: f32[1,128], index: 2, kind: input, shape index: {}]   ;;  %s855_s3 = inlined_call_operand.vmem [shape: f32[1,128], index: 3, kind: input, shape index: {}]   ;;  %s856_s4 = inlined_call_operand.hbm [shape: f32[16,128], index: 4, kind: output, shape index: {}]  }
   0x1   :  { %11 = vsyncpa [#allocation3 + $0x1], 0 }
   0x2   :  { %12 = vsyncpa [#allocation6], 0 }
   0x3   :  { %14 = vsyncpa [#allocation6 + $0x1], 0 }
   0x4   :  { %15 = vsyncpa [#allocation4], 0 }
   0x5   :  { %17 = vsyncpa [#allocation4 + $0x1], 0  ;;  %s632_s15 = smov 0   ;;  %s634_s16 = smov 0  }
   0x6   :  { %s636_s17 = smov 0   ;;  %s638_s18 = smov 0  }
   0x7 LB: > { %s653_s19 = sadd.s32 4294967295, %s600_s18   ;;  %s398_s20 = sadd.s32 4294967294, %s600_s18   ;;  %s600_s18 = sphi %s638_s18, %s875_s18   ;;  %s596_s17 = sphi %s636_s17, %s874_s17   ;;  %s592_s16 = sphi %s634_s16, %s873_s16   ;;  %s588_s15 = sphi %s632_s15, %s872_s15  }
   0x8   : > { %s657_s21 = sadd.s32 1, %s600_s18   ;;  %s30_s22 = sadd.s32 1, %s596_s17 }
   0x9   : > { %s27_s23 = ssub.s32 %s600_s18, %s657_s21  ;;  %p37_p0 = scmp.ne.s32.totalorder %s596_s17, %s592_s16 }
   0xa   : > { %p28_p1 = scmp.eq.s32.totalorder %s27_s23, 0  ;;  %p38_p2 = scmp.eq.s32.totalorder %s600_s18, 0 }
   0xb   : > { %p43_p3 = scmp.ne.s32.totalorder %s592_s16, %s588_s15  ;;  %p44_p4 = scmp.eq.s32.totalorder %s653_s19, 0 }
   0xc   : > { %s669_s24 = scalar_select %p28_p1, %s596_s17, %s30_s22  }
   0xd   : > { %p671_p5 = por %p38_p2, %p37_p0  ;;  %p675_p6 = por %p44_p4, %p43_p3 }
   0xe   : > { %p135_p7 = scmp.eq.s32.totalorder %s653_s19, 1  ;;  %p141_p8 = scmp.eq.s32.totalorder %s398_s20, 1 }
   0xf   : > { %s860_s26 = scalar_select %p675_p6, 1, 0 }
  0x10   : > { %p432_p10 = scmp.lt.s32.totalorder %s600_s18, 2  ;;  %p682_p11 = por %p135_p7, %p37_p0 }
  0x11   : > { %p686_p12 = por %p141_p8, %p43_p3  ;;  %s691_s29 = sand.u32 1, %s596_s17  }
  0x12   : > { %s861_s27 = scalar_select %p682_p11, 1, 0 }
  0x13   : > { %s862_s28 = scalar_select %p686_p12, 1, 0 }
  0x14   : > { %s402_s30 = sshll.u32 %s600_s18, 7  ;;  %s401_s5 = sshll.u32 %s691_s29, 3 }
  0x15   : > { %s700_s8 = scalar_lea.hbm %s852_s0, %s402_s30  ;;  %s171_s9 = scalar_lea.vmem [#allocation2], %s401_s5 }
  0x16   : > { %s178_s10 = sshll.u32 %s171_s9, 4  ;;  %p706_p13 = pnand %p432_p10, %p671_p5  ;;  %s710_s10 = int_to_ptr.vmem [resolvable:$true] %s178_s10 }
  0x17   : > { %s168_s12 = scalar_lea.sflag [#allocation3], %s691_s29  ;;  %s470_s13 = scalar_lea.hbm %s700_s8, 128 }
  0x18   : > { %p471_p2 = scmp.ne.s32.totalorder %s700_s8, %s470_s13  ;;  %p472_p3 = pneg %p706_p13 }
  0x19   : > { %s475_s22 = scalar_lea.hbm %s852_s0, 256  ;;  %p476_p5 = scmp.lt.u32.totalorder %s700_s8, %s852_s0 }
  0x1a   : > { %p473_p4 = pnand %p472_p3, %p471_p2  ;;  %p477_p8 = scmp.lt.u32.totalorder %s475_s22, %s470_s13 }
  0x1b   : > { %p479_p9 = scmp.lt.u32.totalorder %s470_s13, %s700_s8 }
  0x1c   : > { %p474_p7 = pneg %p473_p4  ;;  %p478_p10 = por %p477_p8, %p476_p5 }
  0x1e   : > { %p480_p0 = por %p479_p9, %p478_p10 }
  0x20   : > { %p481_p1 = pnand %p480_p0, %p474_p7 }
  0x22   : > { %484 = shalt.err (!%p481_p1)
}
  0x23   : > { %s485_s6 = scalar_lea.vmem %s710_s10, 128  ;;  %s602_s7 = smov [#allocation2]  }
  0x24   : > { %p486_p2 = scmp.ne.s32.totalorder %s710_s10, %s485_s6  ;;  %s490_s9 = sshll.u32 %s602_s7, 4  ;;  %s491_s9 = int_to_ptr.vmem [resolvable:$false] %s490_s9 }
  0x25   : > { %s492_s14 = scalar_lea.vmem %s491_s9, 256  ;;  %p493_p11 = scmp.lt.s32.totalorder %s710_s10, %s491_s9 }
  0x26   : > { %p488_p4 = pnand %p486_p2, %p472_p3  ;;  %p494_p5 = scmp.lt.s32.totalorder %s492_s14, %s485_s6 }
  0x28   : > { %p489_p12 = pneg %p488_p4  ;;  %p495_p8 = por %p494_p5, %p493_p11 }
  0x2a   : > { %p496_p9 = pnand %p495_p8, %p489_p12 }
  0x2c   : > { %499 = shalt.err (!%p496_p9)
}
  0x2d   : > { %424 = dma.hbm_to_vmem [thread:$0]  (!%p706_p13), %s700_s8, 128, %s710_s10, %s168_s12  }
  0x2e   : > { %p864_p0 = scmp.lt.s32.totalorder %s600_s18, 3  ;;  %p865_p1 = scmp.ge.s32.totalorder %s600_s18, 1 }
  0x2f   : > { %s753_s23 = scalar_lea.hbm %s853_s1, %s402_s30  ;;  %s189_s25 = scalar_lea.vmem [#allocation5], %s401_s5 }
  0x30   : > { %p744_p7 = pnand %p865_p1, %p864_p0  ;;  %s196_s6 = sshll.u32 %s189_s25, 4  ;;  %s197_s6 = int_to_ptr.vmem [resolvable:$true] %s196_s6 }
  0x31   : > { %s186_s8 = scalar_lea.sflag [#allocation6], %s691_s29  ;;  %s500_s10 = scalar_lea.hbm %s753_s23, 128 }
  0x32   : > { %s866_s13 = scalar_select %p744_p7, 1, 0 }
  0x33   : > { %p501_p11 = scmp.ne.s32.totalorder %s753_s23, %s500_s10  ;;  %s505_s30 = scalar_lea.hbm %s853_s1, 256 }
  0x34   : > { %p506_p2 = scmp.lt.u32.totalorder %s753_s23, %s853_s1  ;;  %p507_p4 = scmp.lt.u32.totalorder %s505_s30, %s500_s10 }
  0x35   : > { %p503_p12 = pnand %p501_p11, %p472_p3  ;;  %p509_p8 = scmp.lt.u32.totalorder %s500_s10, %s753_s23 }
  0x36   : > { %p508_p5 = por %p507_p4, %p506_p2 }
  0x37   : > { %p504_p10 = pneg %p503_p12 }
  0x38   : > { %p510_p9 = por %p509_p8, %p508_p5 }
  0x3a   : > { %p511_p0 = pnand %p510_p9, %p504_p10 }
  0x3c   : > { %514 = shalt.err (!%p511_p0)
}
  0x3d   : > { %s515_s29 = scalar_lea.vmem %s197_s6, 128  ;;  %s603_s5 = smov [#allocation5]  }
  0x3e   : > { %p516_p1 = scmp.ne.s32.totalorder %s197_s6, %s515_s29  ;;  %s520_s20 = sshll.u32 %s603_s5, 4  ;;  %s521_s20 = int_to_ptr.vmem [resolvable:$false] %s520_s20 }
  0x3f   : > { %s522_s22 = scalar_lea.vmem %s521_s20, 256  ;;  %p523_p6 = scmp.lt.s32.totalorder %s197_s6, %s521_s20 }
  0x40   : > { %p518_p11 = pnand %p516_p1, %p472_p3  ;;  %p524_p7 = scmp.lt.s32.totalorder %s522_s22, %s515_s29 }
  0x42   : > { %p519_p12 = pneg %p518_p11  ;;  %p525_p2 = por %p524_p7, %p523_p6 }
  0x44   : > { %p526_p4 = pnand %p525_p2, %p519_p12 }
  0x46   : > { %529 = shalt.err (!%p526_p4)
}
  0x47   : > { %427 = dma.hbm_to_vmem [thread:$0]  (!%p706_p13), %s753_s23, 128, %s197_s6, %s186_s8  }
  0x48   : > { %p867_p10 = scmp.ne.s32.totalorder %s866_s13, 0 }
  0x49   : > { %s780_s25 = sand.u32 (!%p867_p10), 1, %s592_s16   ;;  %p868_p6 = scmp.ne.s32.totalorder (!%p867_p10), %s860_s26, 0 }
  0x4a   : > { %205 = sbr.rel (%p867_p10) target bundleno = 354 (0x162), region = 36  ;;  %s783_s10 = sshll.u32 (!%p867_p10), %s780_s25, 3 }
  0x4b   : > { %s208_s12 = scalar_lea.sflag (!%p867_p10), [#allocation3], %s780_s25  ;;  %s211_s7 = scalar_lea.vmem (!%p867_p10), [#allocation2], %s783_s10 }
  0x51   : > { %575 = dma.done.wait (%p868_p6), %s208_s12, 128  }
  0x52   : > { %577 = vsyncadd (%p868_p6), %s208_s12, 4294967168  ;;  %s217_s11 = scalar_lea.sflag [#allocation6], %s780_s25  ;;  %s220_s13 = scalar_lea.vmem [#allocation5], %s783_s10 }
  0x53   : > { %579 = dma.done.wait (%p868_p6), %s217_s11, 128  }
  0x54   : > { %581 = vsyncadd (%p868_p6), %s217_s11, 4294967168  ;;  %v250_v0 = vld [vmem:[%s211_s7] sm:$0xff]  ;;  %v251_v1 = vld [vmem:[%s220_s13] sm:$0xff]  ;;  %s604_s8 = smov 126   ;;  %s605_s26 = smov 2   ;;  %v283_v19 = vlaneseq }
  0x55   : > { %v409_v2 = vld [vmem:[%s855_s3] ss:$0 sm:$0xff]  ;;  %268 = vrot.lane.b32.xlu0 %v250_v0, %s604_s8  ;;  %s412_s14 = sshll.u32 %s653_s19, 7  ;;  %s249_s29 = scalar_lea.vmem [#allocation7], %s783_s10 }
  0x56   : > { %v259_v3 = vmul.f32 %v409_v2, %v251_v1  ;;  %v410_v4 = vld [vmem:[%s854_s2] ss:$0 sm:$0xff]  ;;  %v284_v20 = vand.u32 127, %v283_v19  ;;  %s305_s5 = sshll.u32 %s249_s29, 4  ;;  %s808_s12 = scalar_lea.hbm %s856_s4, %s412_s14  ;;  %s810_s5 = int_to_ptr.vmem [resolvable:$true] %s305_s5 }
  0x57   : > { %s292_s7 = scalar_lea.sflag [#allocation4], %s780_s25  ;;  %s530_s11 = scalar_lea.vmem %s810_s5, 128 }
  0x58   : > { %v267_v5 = vadd.f32 %v410_v4, %v259_v3  ;;  %v285_v21 = vand.u32 3, %v284_v20  ;;  %p531_p13 = scmp.ne.s32.totalorder %s810_s5, %s530_s11  ;;  %p869_p3 = scmp.ne.s32.totalorder %s861_s27, 0 }
  0x59   : > { %s606_s19 = smov [#allocation7]  }
  0x5a   : > { %v275_v6 = vmul.f32 1.442695, %v267_v5  ;;  %vm286_vm0 = vcmp.lt.s32.totalorder %v285_v21, 2  ;;  %p532_p7 = pnand %p531_p13, %p869_p3  ;;  %s534_s10 = sshll.u32 %s606_s19, 4  ;;  %s535_s10 = int_to_ptr.vmem [resolvable:$false] %s534_s10 }
  0x5b   : > { %s536_s13 = scalar_lea.vmem %s535_s10, 256  ;;  %p537_p8 = scmp.lt.s32.totalorder %s810_s5, %s535_s10 }
  0x5c   : > { %468 = vpow2.f32 %v275_v6  ;;  %p533_p5 = pneg %p532_p7  ;;  %p538_p9 = scmp.lt.s32.totalorder %s536_s13, %s530_s11 }
  0x5e   : > { %p539_p0 = por %p538_p9, %p537_p8 }
  0x60   : > { %p540_p1 = pnand %p539_p0, %p533_p5 }
  0x66   : > { %v469_v7 = vpop.eup %468 }
  0x67   : > { %277 = vrot.lane.b32.xlu0 %v469_v7, %s604_s8 }
  0xc7   : > { %v269_v8 = vpop.permute.xlu0 %268 }
  0xc8   : > { %v270_v9 = vsub.f32 %v269_v8, %v250_v0 }
  0xca   : > { %v271_v10 = vmul.f32 0.5, %v270_v9  ;;  %v273_v11 = vmul.f32 %v270_v9, %v267_v5 }
  0xcc   : > { %v272_v12 = vadd.f32 %v271_v10, %v250_v0 }
  0xce   : > { %v274_v15 = vadd.f32 %v273_v11, %v272_v12 }
  0xd9   : > { %v278_v13 = vpop.permute.xlu0 %277 }
  0xda   : > { %v279_v14 = vmul.f32 %v278_v13, %v270_v9 }
  0xdc   : > { %v280_v16 = vmul.f32 0.5, %v279_v14 }
  0xde   : > { %v281_v17 = vsub.f32 %v274_v15, %v280_v16  ;;  %v282_v18 = vadd.f32 %v280_v16, %v274_v15 }
  0xe0   : > { %287 = vrot.lane.b32.xlu1 %v282_v18, %s605_s26 }
 0x152   : > { %v288_v22 = vpop.permute.xlu1 %287 }
 0x153   : > { %v289_v23 = vsel %vm286_vm0, %v281_v17, %v288_v22 }
 0x154   : > { %290 = vst [vmem:[%s249_s29] sm:$0xff] %v289_v23 }
 0x155   : > { %543 = shalt.err (!%p540_p1)
}
 0x156   : > { %s544_s25 = scalar_lea.hbm %s808_s12, 128  ;;  %s548_s8 = scalar_lea.hbm %s856_s4, 256 }
 0x157   : > { %p545_p11 = scmp.ne.s32.totalorder %s808_s12, %s544_s25  ;;  %p549_p4 = scmp.lt.u32.totalorder %s808_s12, %s856_s4 }
 0x158   : > { %p550_p10 = scmp.lt.u32.totalorder %s548_s8, %s544_s25  ;;  %p552_p13 = scmp.lt.u32.totalorder %s544_s25, %s808_s12 }
 0x159   : > { %p546_p12 = pnand %p545_p11, %p869_p3 }
 0x15a   : > { %p551_p6 = por %p550_p10, %p549_p4 }
 0x15b   : > { %p547_p2 = pneg %p546_p12 }
 0x15c   : > { %p553_p7 = por %p552_p13, %p551_p6 }
 0x15e   : > { %p554_p5 = pnand %p553_p7, %p547_p2 }
 0x160   : > { %557 = shalt.err (!%p554_p5)
}
 0x161   : > { %419 = dma.vmem_to_hbm [thread:$0]  (%p869_p3), %s810_s5, 128, %s808_s12, %s292_s7  }
 0x162 PF: > { %s317_s26 = sand.u32 1, %s588_s15   ;;  %p870_p8 = scmp.ne.s32.totalorder %s862_s28, 0 }
 0x163   : > { %p871_p9 = scmp.ge.s32.totalorder %s600_s18, 2  ;;  %s318_s14 = scalar_lea.sflag [#allocation4], %s317_s26 }
 0x165   : > { %p429_p0 = pnand %p871_p9, %p870_p8 }
 0x167   : > { %583 = dma.done.wait (!%p429_p0), %s318_s14, 128  }
 0x168   : > { %585 = vsyncadd (!%p429_p0), %s318_s14, 4294967168  ;;  %p20_p1 = scmp.ge.s32.totalorder %s657_s21, 4   ;;  %s872_s15 = smov %s592_s16 }
 0x169   : > { %s873_s16 = smov %s596_s17  ;;  %s874_s17 = smov %s669_s24 }
 0x16a   : > { %s875_s18 = smov %s657_s21  ;;  %22 = sbr.rel (!%p20_p1) target bundleno = 7 (0x7), region = 94 }
 0x171   :  { %323 = vsyncpa [#allocation3], 1 }
 0x172   :  { %325 = vsyncpa [#allocation3 + $0x1], 1 }
 0x173   :  { %326 = vsyncpa [#allocation6], 1 }
 0x174   :  { %328 = vsyncpa [#allocation6 + $0x1], 1 }
 0x175   :  { %329 = vsyncpa [#allocation4], 1 }
 0x176   :  { %331 = vsyncpa [#allocation4 + $0x1], 1 }

</bundles_post_ra>
